<compile_context>
chip_gen: v7x
topology: tpu7x:2x2x1
jax: 0.10.0
libtpu: 0.0.40
codegen_flags: <defaults>
</compile_context>

<pallas_src>
import functools

import jax
import jax.numpy as jnp
from jax.experimental import pallas as pl
from jax.experimental.pallas import tpu as pltpu


def _kd_loss_kernel(student_ref, teacher_ref, out_ref, *, temperature, batch, block_b):
    inv_t = 1.0 / temperature
    s = student_ref[...].astype(jnp.float32) * inv_t            # (TB, C)
    t = teacher_ref[...].astype(jnp.float32) * inv_t            # (TB, C)

    # student log-sum-exp over classes (numerically stable)
    s_max = jnp.max(s, axis=1, keepdims=True)                   # (TB, 1)
    s_shift = s - s_max                                         # (TB, C)
    s_lse = jnp.log(jnp.sum(jnp.exp(s_shift), axis=1, keepdims=True))  # (TB, 1)

    # teacher unnormalized softmax weights
    t_max = jnp.max(t, axis=1, keepdims=True)                   # (TB, 1)
    t_exp = jnp.exp(t - t_max)                                  # (TB, C)
    t_sum = jnp.sum(t_exp, axis=1, keepdims=True)               # (TB, 1)

    # teacher-weighted sum of the student shifted logits (single (TB,C) multiply)
    ws = jnp.sum(t_exp * s_shift, axis=1, keepdims=True)        # (TB, 1)

    # per-row CE: sum_c(-softmax(t) * log_softmax(s)) = s_lse - ws / t_sum
    # (normalization folded into a per-row scalar; exact divide keeps tight accuracy)
    per_row = s_lse - ws / t_sum                                # (TB, 1)

    # mask padded rows of a ragged last tile so the wrapper mean is over true B
    i = pl.program_id(0)
    row = jax.lax.broadcasted_iota(jnp.int32, per_row.shape, 0) + i * block_b
    per_row = jnp.where(row < batch, per_row, 0.0)

    # lane/sublane-dense partial output tile (one full vreg, unmasked store)
    partial = jnp.sum(per_row)                                  # scalar partial sum
    out_ref[...] = jnp.broadcast_to(partial, out_ref.shape).astype(out_ref.dtype)


def _choose_block_b(batch, classes, itemsize):
    """Batch tile: big enough to amortize the ~0.35us per-grid-step overhead,
    small enough that 2 inputs x 2 pipeline buffers fit scoped VMEM on all
    generations (v7x = 64 MiB physical)."""
    sublane = 8 if itemsize >= 4 else (16 if itemsize == 2 else 32)
    if batch <= sublane:
        return batch                        # single block covering the full batch dim
    target_block_bytes = 4 * 1024 * 1024    # ~4 MiB per input block
    rows = target_block_bytes // max(classes * itemsize, 1)
    rows = max(sublane, min(rows, batch, 4096))
    rows = (rows // sublane) * sublane
    return max(rows, sublane)


def kd_loss(student_output, teacher_output, temperature=1.0, block_b=None):
    assert student_output.shape == teacher_output.shape
    assert student_output.ndim == 2
    B, C = student_output.shape
    itemsize = jnp.dtype(student_output.dtype).itemsize
    if block_b is None:
        block_b = _choose_block_b(B, C, itemsize)
    block_b = min(block_b, B)
    num_tiles = pl.cdiv(B, block_b)

    # scoped-VMEM budget: 2 inputs x 2 pipeline buffers + output buffers + slack
    needed = 2 * 2 * block_b * C * itemsize + 2 * (8 * 128 * 4) + (2 << 20)
    vmem_limit = int(min(max(needed, 32 << 20), 60 << 20))   # 60 MiB is safe even on v7x

    kernel = functools.partial(
        _kd_loss_kernel, temperature=float(temperature), batch=B, block_b=block_b)

    partials = pl.pallas_call(
        kernel,
        out_shape=jax.ShapeDtypeStruct((num_tiles, 8, 128), jnp.float32),
        grid=(num_tiles,),
        in_specs=[
            pl.BlockSpec((block_b, C), lambda i: (i, 0)),
            pl.BlockSpec((block_b, C), lambda i: (i, 0)),
        ],
        out_specs=pl.BlockSpec((1, 8, 128), lambda i: (i, 0, 0)),
        compiler_params=pltpu.CompilerParams(
            dimension_semantics=("parallel",),
            vmem_limit_bytes=vmem_limit,
        ),
    )(student_output, teacher_output)

    # finish: mean over the true batch size, scale by T^2 (tiny, done in XLA)
    return (float(temperature) ** 2) * jnp.sum(partials[:, 0, 0]) / B


def _kd_loss_ref(student_output, teacher_output, temperature=1.0):
    s = student_output.astype(jnp.float32) / temperature
    t = teacher_output.astype(jnp.float32) / temperature
    t_soft = jax.nn.softmax(t, axis=1)
    s_logsoft = jax.nn.log_softmax(s, axis=1)
    return (temperature ** 2) * jnp.mean(jnp.sum(-t_soft * s_logsoft, axis=1))


if __name__ == "__main__":
    key = jax.random.PRNGKey(0)
    k1, k2, k3, k4 = jax.random.split(key, 4)
    temperature = 2.0   # module default is 1; use 2 to exercise the T^2 scaling

    # 1) small shipped case (B=8, C=32).  NOTE: at this size the kernel is pure
    #    launch/DMA overhead; it exists for correctness, not speed.
    B, C = 8, 32
    student = jax.random.normal(k1, (B, C), dtype=jnp.float32)
    teacher = jax.random.normal(k2, (B, C), dtype=jnp.float32)
    loss = jax.block_until_ready(kd_loss(student, teacher, temperature=temperature))
    ref = _kd_loss_ref(student, teacher, temperature=temperature)
    assert jnp.allclose(loss, ref, rtol=1e-5, atol=1e-5), (loss, ref)

    # 2) tiled + ragged batch (exercises the grid, row masking, partial outputs)
    B2, C2 = 20, 256
    s2 = jax.random.normal(k3, (B2, C2), dtype=jnp.float32)
    t2 = jax.random.normal(k4, (B2, C2), dtype=jnp.float32)
    loss2 = jax.block_until_ready(kd_loss(s2, t2, temperature=temperature, block_b=8))
    ref2 = _kd_loss_ref(s2, t2, temperature=temperature)
    assert jnp.allclose(loss2, ref2, rtol=1e-5, atol=1e-5), (loss2, ref2)

    # 3) bf16 inputs stay bf16 through the DMA; upcast happens inside the kernel
    s3 = s2.astype(jnp.bfloat16)
    t3 = t2.astype(jnp.bfloat16)
    loss3 = jax.block_until_ready(kd_loss(s3, t3, temperature=temperature))
    ref3 = _kd_loss_ref(s3.astype(jnp.float32), t3.astype(jnp.float32),
                        temperature=temperature)
    assert jnp.allclose(loss3, ref3, rtol=1e-3, atol=1e-3), (loss3, ref3)

    print("KERNEL_OK")
</pallas_src>

<mosaic_0001>
module attributes {stable_mosaic.version = 11 : i64} {
  func.func @_kd_loss_kernel(%arg0: i32, %arg1: memref<8x32xf32, #tpu.memory_space<vmem>>, %arg2: memref<8x32xf32, #tpu.memory_space<vmem>>, %arg3: memref<1x8x128xf32, #tpu.memory_space<vmem>>) attributes {dimension_semantics = [#tpu.dimension_semantics<parallel>], iteration_bounds = array<i64: 1>, scalar_prefetch = 0 : i64, scratch_operands = 0 : i64, tpu.core_type = #tpu.core_type<tc>, window_params = [{transform_indices = @transform_0, window_bounds = array<i64: 8, 32>}, {transform_indices = @transform_1, window_bounds = array<i64: 8, 32>}, {transform_indices = @transform_2, window_bounds = array<i64: 1, 8, 128>}]} {
    %c0 = arith.constant 0 : index
    %c0_0 = arith.constant 0 : index
    %0 = vector.load %arg1[%c0, %c0_0] : memref<8x32xf32, #tpu.memory_space<vmem>>, vector<8x32xf32>
    %cst = arith.constant 5.000000e-01 : f32
    %1 = vector.broadcast %cst : f32 to vector<8x32xf32>
    %2 = arith.mulf %0, %1 : vector<8x32xf32>
    %c0_1 = arith.constant 0 : index
    %c0_2 = arith.constant 0 : index
    %3 = vector.load %arg2[%c0_1, %c0_2] : memref<8x32xf32, #tpu.memory_space<vmem>>, vector<8x32xf32>
    %cst_3 = arith.constant 5.000000e-01 : f32
    %4 = vector.broadcast %cst_3 : f32 to vector<8x32xf32>
    %5 = arith.mulf %3, %4 : vector<8x32xf32>
    %cst_4 = arith.constant dense<0xFF800000> : vector<8xf32>
    %6 = vector.multi_reduction <maximumf>, %2, %cst_4 [1] : vector<8x32xf32> to vector<8xf32>
    %7 = vector.shape_cast %6 : vector<8xf32> to vector<8x1xf32>
    %8 = vector.broadcast %7 : vector<8x1xf32> to vector<8x32xf32>
    %9 = arith.subf %2, %8 : vector<8x32xf32>
    %10 = math.exp %9 : vector<8x32xf32>
    %cst_5 = arith.constant dense<0.000000e+00> : vector<8xf32>
    %11 = vector.multi_reduction <add>, %10, %cst_5 [1] : vector<8x32xf32> to vector<8xf32>
    %12 = vector.shape_cast %11 : vector<8xf32> to vector<8x1xf32>
    %13 = math.log %12 : vector<8x1xf32>
    %cst_6 = arith.constant dense<0xFF800000> : vector<8xf32>
    %14 = vector.multi_reduction <maximumf>, %5, %cst_6 [1] : vector<8x32xf32> to vector<8xf32>
    %15 = vector.shape_cast %14 : vector<8xf32> to vector<8x1xf32>
    %16 = vector.broadcast %15 : vector<8x1xf32> to vector<8x32xf32>
    %17 = arith.subf %5, %16 : vector<8x32xf32>
    %18 = math.exp %17 : vector<8x32xf32>
    %cst_7 = arith.constant dense<0.000000e+00> : vector<8xf32>
    %19 = vector.multi_reduction <add>, %18, %cst_7 [1] : vector<8x32xf32> to vector<8xf32>
    %20 = vector.shape_cast %19 : vector<8xf32> to vector<8x1xf32>
    %21 = arith.mulf %18, %9 : vector<8x32xf32>
    %cst_8 = arith.constant dense<0.000000e+00> : vector<8xf32>
    %22 = vector.multi_reduction <add>, %21, %cst_8 [1] : vector<8x32xf32> to vector<8xf32>
    %23 = vector.shape_cast %22 : vector<8xf32> to vector<8x1xf32>
    %24 = arith.divf %23, %20 : vector<8x1xf32>
    %25 = arith.subf %13, %24 : vector<8x1xf32>
    %26 = tpu.iota {dimensions = array<i32: 0>} : vector<8x1xi32>
    %c8_i32 = arith.constant 8 : i32
    %27 = arith.muli %arg0, %c8_i32 : i32
    %28 = vector.broadcast %27 : i32 to vector<8x1xi32>
    %29 = arith.addi %26, %28 : vector<8x1xi32>
    %c8_i32_9 = arith.constant 8 : i32
    %30 = vector.broadcast %c8_i32_9 : i32 to vector<8x1xi32>
    %31 = arith.cmpi slt, %29, %30 : vector<8x1xi32>
    %cst_10 = arith.constant 0.000000e+00 : f32
    %32 = vector.broadcast %cst_10 : f32 to vector<8x1xf32>
    %33 = arith.select %31, %25, %32 : vector<8x1xi1>, vector<8x1xf32>
    %34 = vector.shape_cast %33 : vector<8x1xf32> to vector<1x8x1xf32>
    %cst_11 = arith.constant dense<0.000000e+00> : vector<1xf32>
    %35 = vector.multi_reduction <add>, %34, %cst_11 [1, 2] : vector<1x8x1xf32> to vector<1xf32>
    %36 = vector.shape_cast %35 : vector<1xf32> to vector<1x1x1xf32>
    %37 = vector.extract %36[0, 0, 0] : f32 from vector<1x1x1xf32>
    %38 = vector.broadcast %37 : f32 to vector<1x8x128xf32>
    %c0_12 = arith.constant 0 : index
    %c0_13 = arith.constant 0 : index
    %c0_14 = arith.constant 0 : index
    %39 = vector.load %arg3[%c0_12, %c0_13, %c0_14] : memref<1x8x128xf32, #tpu.memory_space<vmem>>, vector<1x8x128xf32>
    tpu.vector_store %arg3[%c0_12, %c0_13, %c0_14], %38 {strides = array<i32>} : memref<1x8x128xf32, #tpu.memory_space<vmem>>, vector<1x8x128xf32>,
    return
  }
  func.func @transform_0(%arg0: i32) -> (i32, i32) {
    %c0_i32 = arith.constant 0 : i32
    %c0_i32_0 = arith.constant 0 : i32
    return %arg0, %c0_i32 : i32, i32
  }
  func.func @transform_1(%arg0: i32) -> (i32, i32) {
    %c0_i32 = arith.constant 0 : i32
    %c0_i32_0 = arith.constant 0 : i32
    return %arg0, %c0_i32 : i32, i32
  }
  func.func @transform_2(%arg0: i32) -> (i32, i32, i32) {
    %c0_i32 = arith.constant 0 : i32
    %c0_i32_0 = arith.constant 0 : i32
    %c0_i32_1 = arith.constant 0 : i32
    return %arg0, %c0_i32, %c0_i32_0 : i32, i32, i32
  }
}

</mosaic_0001>

<bundles_post_ra>
// kernel: tpu_custom_call.1
= control target key start
LH: loop header
LB: loop body
LE: loop exit
PB: predicated region body
PF: predicated region fallthrough
CT: control target
= control target key end

     0   :  { %7 = vsyncpa [#allocation3], 0  ;;  %s248_s0 = inlined_call_operand.hbm [shape: f32[8,32], index: 0, kind: input, shape index: {}]   ;;  %s249_s1 = inlined_call_operand.hbm [shape: f32[8,32], index: 1, kind: input, shape index: {}]   ;;  %s250_s2 = inlined_call_operand.hbm [shape: f32[1,8,128], index: 2, kind: output, shape index: {}]  }
   0x1   :  { %8 = vsyncpa [#allocation6], 0 }
   0x2   :  { %9 = vsyncpa [#allocation4], 0  ;;  %s189_s9 = smov [#allocation2]   ;;  %s190_s11 = smov [#allocation5]  }
   0x3   :  { %s16_s10 = sshll.u32 %s189_s9, 4  ;;  %s26_s12 = sshll.u32 %s190_s11, 4  ;;  %s17_s10 = int_to_ptr.vmem [resolvable:$true] %s16_s10  ;;  %s27_s12 = int_to_ptr.vmem [resolvable:$true] %s26_s12 }
   0x4   :  { %s117_s15 = scalar_lea.hbm %s248_s0, 128 }
   0x5   :  { %p118_p0 = scmp.ne.s32.totalorder %s248_s0, %s117_s15  ;;  %p121_p1 = scmp.lt.u32.totalorder %s117_s15, %s248_s0 }
   0x7   :  { %p123_p2 = pnand %p121_p1, %p118_p0 }
   0x9   :  { %126 = shalt.err (!%p123_p2)
}
   0xa   :  { %s127_s20 = scalar_lea.vmem %s17_s10, 128  ;;  %p132_p4 = scmp.lt.s32.totalorder %s17_s10, %s17_s10 }
   0xb   :  { %p128_p3 = scmp.ne.s32.totalorder %s17_s10, %s127_s20  ;;  %p133_p5 = scmp.lt.s32.totalorder %s127_s20, %s127_s20 }
   0xd   :  { %p134_p6 = por %p133_p5, %p132_p4 }
   0xf   :  { %p135_p7 = pnand %p134_p6, %p128_p3 }
  0x11   :  { %138 = shalt.err (!%p135_p7)
}
  0x12   :  { %19 = dma.hbm_to_vmem [thread:$0]  %s248_s0, 128, %s17_s10, [#allocation3]  }
  0x13   :  { %s139_s25 = scalar_lea.hbm %s249_s1, 128 }
  0x14   :  { %p140_p8 = scmp.ne.s32.totalorder %s249_s1, %s139_s25  ;;  %p143_p9 = scmp.lt.u32.totalorder %s139_s25, %s249_s1 }
  0x16   :  { %p145_p10 = pnand %p143_p9, %p140_p8 }
  0x18   :  { %148 = shalt.err (!%p145_p10)
}
  0x19   :  { %s149_s30 = scalar_lea.vmem %s27_s12, 128  ;;  %p154_p12 = scmp.lt.s32.totalorder %s27_s12, %s27_s12 }
  0x1a   :  { %p150_p11 = scmp.ne.s32.totalorder %s27_s12, %s149_s30  ;;  %p155_p13 = scmp.lt.s32.totalorder %s149_s30, %s149_s30 }
  0x1c   :  { %p156_p0 = por %p155_p13, %p154_p12 }
  0x1e   :  { %p157_p1 = pnand %p156_p0, %p150_p11 }
  0x20   :  { %160 = shalt.err (!%p157_p1)
}
  0x21   :  { %29 = dma.hbm_to_vmem [thread:$0]  %s249_s1, 128, %s27_s12, [#allocation6]  }
  0x22   :  { %183 = dma.done.wait [#allocation3], 128  }
  0x23   :  { %184 = vsyncadd [#allocation3], 4294967168 }
  0x24   :  { %185 = dma.done.wait [#allocation6], 128  }
  0x25   :  { %186 = vsyncadd [#allocation6], 4294967168  ;;  %v36_v0 = vld [vmem:[#allocation2] sm:$0xff]  ;;  %vm40_vm0 = vcmask 261120   ;;  %v38_v1 = vld [vmem:[#allocation5] sm:$0xff]  ;;  %vm75_vm1 = vcmask 7168  }
  0x26   :  { %v37_v2 = vmul.f32 0.5, %v36_v0  ;;  %v39_v3 = vmul.f32 0.5, %v38_v1  ;;  %s191_s1 = smov [#allocation7]  }
  0x27   :  { %s94_s4 = sshll.u32 %s191_s1, 4  ;;  %s95_s4 = int_to_ptr.vmem [resolvable:$true] %s94_s4 }
  0x28   :  { %v41_v4 = vsel %vm40_vm0, %v37_v2, -inf  ;;  %v52_v5 = vsel %vm40_vm0, %v39_v3, -inf  ;;  %s161_s6 = scalar_lea.vmem %s95_s4, 128  ;;  %p166_p3 = scmp.lt.s32.totalorder %s95_s4, %s95_s4 }
  0x29   :  { %42 = vmax.xlane.f32.xlu0 %v41_v4  ;;  %p162_p2 = scmp.ne.s32.totalorder %s95_s4, %s161_s6  ;;  %p167_p4 = scmp.lt.s32.totalorder %s161_s6, %s161_s6 }
  0x2b   :  { %p168_p5 = por %p167_p4, %p166_p3 }
  0x2d   :  { %53 = vmax.xlane.f32.xlu0 %v52_v5  ;;  %p169_p6 = pnand %p168_p5, %p162_p2 }
  0xb6   :  { %v43_v6 = vpop.xlane.xlu0 %42 }
  0xb7   :  { %v44_v7 = vsub.f32 %v37_v2, %v43_v6 }
  0xb9   :  { %v45_v8 = vmul.f32 1.442695, %v44_v7 }
  0xba   :  { %v54_v9 = vpop.xlane.xlu0 %53 }
  0xbb   :  { %109 = vpow2.f32 %v45_v8  ;;  %v55_v10 = vsub.f32 %v39_v3, %v54_v9 }
  0xbd   :  { %v56_v11 = vmul.f32 1.442695, %v55_v10 }
  0xbf   :  { %111 = vpow2.f32 %v56_v11 }
  0xc5   :  { %v110_v12 = vpop.eup %109 }
  0xc6   :  { %v47_v13 = vsel %vm40_vm0, %v110_v12, 0.0 }
  0xc7   :  { %48 = vadd.xlane.f32.xlu1 %v47_v13 }
  0xc9   :  { %v112_v14 = vpop.eup %111 }
  0xca   :  { %v58_v15 = vsel %vm40_vm0, %v112_v14, 0.0  ;;  %v61_v16 = vmul.f32 %v112_v14, %v44_v7 }
  0xcb   :  { %59 = vadd.xlane.f32.xlu1 %v58_v15 }
  0xcc   :  { %v62_v17 = vsel %vm40_vm0, %v61_v16, 0.0 }
  0xcd   :  { %63 = vadd.xlane.f32.xlu0 %v62_v17 }
 0x154   :  { %v49_v18 = vpop.xlane.xlu1 %48 }
 0x155   :  { %113 = vlog2.f32 %v49_v18 }
 0x158   :  { %v60_v19 = vpop.xlane.xlu1 %59 }
 0x159   :  { %115 = vrcp.f32 %v60_v19 }
 0x15a   :  { %v64_v22 = vpop.xlane.xlu0 %63 }
 0x15f   :  { %v114_v20 = vpop.eup %113 }
 0x160   :  { %v51_v23 = vmul.f32 0.6931472, %v114_v20 }
 0x163   :  { %v116_v21 = vpop.eup %115 }
 0x164   :  { %v66_v24 = vmul.f32 %v116_v21, %v64_v22 }
 0x166   :  { %v67_v25 = vsub.f32 %v51_v23, %v66_v24 }
 0x168   :  { %v76_v26 = vsel %vm75_vm1, %v67_v25, 0.0 }
 0x169   :  { %77 = vadd.xlane.f32.xlu1 %v76_v26 }
 0x1f6   :  { %v78_v27 = vpop.xlane.xlu1 %77 }
 0x1f7   :  { %v79_v28 = vrot.slane %v78_v27, 4 }
 0x1f9   :  { %v80_v29 = vadd.f32 %v79_v28, %v78_v27 }
 0x1fb   :  { %v81_v30 = vrot.slane %v80_v29, 2 }
 0x1fd   :  { %v82_v31 = vadd.f32 %v81_v30, %v80_v29 }
 0x1ff   :  { %v83_v32 = vrot.slane %v82_v31, 1 }
 0x201   :  { %v84_v33 = vadd.f32 %v83_v32, %v82_v31 }
 0x203   :  { %104 = vpush %v84_v33 }
 0x234   :  { %s105_s5 = spop %104 }
 0x235   :  { %v86_v34 = vstv %s105_s5 }
 0x236   :  { %87 = vst [vmem:[#allocation7] sm:$0xff] %v86_v34 }
 0x237   :  { %172 = shalt.err (!%p169_p6)
}
 0x238   :  { %s173_s9 = scalar_lea.hbm %s250_s2, 128 }
 0x239   :  { %p174_p7 = scmp.ne.s32.totalorder %s250_s2, %s173_s9  ;;  %p177_p8 = scmp.lt.u32.totalorder %s173_s9, %s250_s2 }
 0x23b   :  { %p179_p9 = pnand %p177_p8, %p174_p7 }
 0x23d   :  { %182 = shalt.err (!%p179_p9)
}
 0x23e   :  { %97 = dma.vmem_to_hbm [thread:$0]  %s95_s4, 128, %s250_s2, [#allocation4]  }
 0x23f   :  { %187 = dma.done.wait [#allocation4], 128  }
 0x240   :  { %188 = vsyncadd [#allocation4], 4294967168 }
 0x241   :  { %101 = vsyncpa [#allocation3], 1 }
 0x242   :  { %102 = vsyncpa [#allocation6], 1 }
 0x243   :  { %103 = vsyncpa [#allocation4], 1 }

</bundles_post_ra>
